<compile_context>
chip_gen: v5e
topology: v5e:2x2
jax: 0.10.0
libtpu: 0.0.40
codegen_flags: <defaults>
</compile_context>

<pallas_src>
import functools
import math

import jax
import jax.numpy as jnp
from jax.experimental import pallas as pl
from jax.experimental.pallas import tpu as pltpu


def _round_up(x, m):
    return -(-x // m) * m


def _build_stft_call(n_rows, n_t_tiles, tt, hop, r, K_ext, Np, total_chunks):
    """Builds the pallas_call.

    Inputs to the returned callable:
      chunks: (n_rows, total_chunks, hop) f32  -- passed twice (cur / next tile)
      basis:  (K_ext, Np) f32  (hann folded in; cols [N real | N imag | 0-pad],
                                rows >= n_fft are zero)
    Output: (n_rows, n_t_tiles*tt, Np) f32
    """
    Tpad = n_t_tiles * tt

    def kernel(cur_ref, nxt_ref, basis_ref, out_ref):
        cur = cur_ref[0]                          # (tt, hop): chunks [ti*tt, ti*tt+tt)
        if r > 1:
            nxt = nxt_ref[0, : r - 1, :]          # first r-1 chunks of the next tile
            win = jnp.concatenate([cur, nxt], axis=0)   # (tt + r - 1, hop)
        else:
            win = cur
        # Hop-decomposed framing: frame t spans chunks t .. t+r-1, so
        #   out[t, :] = sum_j win[t + j, :] @ basis[j*hop : (j+1)*hop, :]
        # (zero basis rows beyond n_fft make any over-read harmless).
        acc = jnp.dot(win[0:tt, :], basis_ref[0:hop, :],
                      preferred_element_type=jnp.float32)
        for j in range(1, r):
            acc = acc + jnp.dot(win[j:j + tt, :],
                                basis_ref[j * hop:(j + 1) * hop, :],
                                preferred_element_type=jnp.float32)
        out_ref[0] = acc

    # Honest scheduler hint: signal bytes (read ~2x via cur/next operands),
    # resident basis, and the output slab.
    cost = pl.CostEstimate(
        flops=2 * n_rows * Tpad * K_ext * Np,
        transcendentals=0,
        bytes_accessed=4 * (2 * n_rows * total_chunks * hop
                            + K_ext * Np
                            + n_rows * Tpad * Np),
    )

    # VMEM budget: basis (conservatively counted double-buffered), double-
    # buffered cur/next chunk tiles and output tiles, plus headroom.
    vmem_need = 4 * (2 * K_ext * Np + 4 * tt * hop + 2 * tt * Np)
    vmem_limit = int(min(max(2 * vmem_need, 32 * 1024 * 1024), 112 * 1024 * 1024))

    return pl.pallas_call(
        kernel,
        out_shape=jax.ShapeDtypeStruct((n_rows, Tpad, Np), jnp.float32),
        grid_spec=pltpu.PrefetchScalarGridSpec(
            num_scalar_prefetch=0,
            grid=(n_rows, n_t_tiles),
            in_specs=[
                # current tile of hop-sized chunks (streams)
                pl.BlockSpec((1, tt, hop), lambda bc, ti: (bc, ti, 0)),
                # next tile of chunks (supplies the r-1 chunk frame overlap)
                pl.BlockSpec((1, tt, hop), lambda bc, ti: (bc, ti + 1, 0)),
                # windowed DFT basis: constant block index -> VMEM-resident
                pl.BlockSpec((K_ext, Np), lambda bc, ti: (0, 0)),
            ],
            out_specs=pl.BlockSpec((1, tt, Np), lambda bc, ti: (bc, ti, 0)),
        ),
        compiler_params=pltpu.CompilerParams(
            dimension_semantics=("parallel", "parallel"),
            vmem_limit_bytes=vmem_limit,
        ),
        cost_estimate=cost,
    )


def multi_channeled_stft(x, n_fft, hop_length):
    """x: (B, L, C) float32 -> (B, N, T, 2, C) float32  (torch.stft per channel)."""
    B, L, C = x.shape
    hop = hop_length
    N = n_fft // 2 + 1
    pad = n_fft // 2

    # (B, L, C) -> (B, C, L); center=True reflect padding (torch.stft default).
    sig = jnp.transpose(x.astype(jnp.float32), (0, 2, 1))
    sig = jnp.pad(sig, ((0, 0), (0, 0), (pad, pad)), mode="reflect")
    Lp = L + 2 * pad
    T = 1 + (Lp - n_fft) // hop

    # A frame = r consecutive hop-sized chunks (last may over-read past n_fft;
    # the corresponding basis rows are zero, so the product ignores them).
    r = -(-n_fft // hop)
    K_ext = r * hop

    # Frames per grid step: large tile (>=512 where T allows), multiple of 8,
    # and >= r-1 so a frame never spans more than current + next chunk tile.
    tt = max(min(512, _round_up(T, 8)), _round_up(max(r - 1, 1), 8))
    nt = -(-T // tt)
    Tpad = nt * tt

    # Non-overlapping hop-sized chunks of the padded signal (free reshape, no
    # n_fft/hop-inflated frame gather through HBM).  One extra tile of chunks
    # (zero padded) so the "next tile" operand is always in bounds.
    total_chunks = (nt + 1) * tt
    need_len = total_chunks * hop
    sig_flat = sig.reshape(B * C, Lp)
    if need_len > Lp:
        sig_flat = jnp.pad(sig_flat, ((0, 0), (0, need_len - Lp)))
    chunks = sig_flat[:, :need_len].reshape(B * C, total_chunks, hop)

    # DFT basis with the periodic hann window folded in.  Reduce k*f mod n_fft
    # in int32 before scaling so large n_fft keeps f32 accuracy.
    k = jnp.arange(n_fft, dtype=jnp.int32)
    f_ = jnp.arange(N, dtype=jnp.int32)
    kf = (k[:, None] * f_[None, :]) % n_fft
    ang = (2.0 * math.pi / n_fft) * kf.astype(jnp.float32)          # (n_fft, N)
    window = 0.5 * (1.0 - jnp.cos(2.0 * math.pi * k.astype(jnp.float32) / n_fft))
    basis = window[:, None] * jnp.concatenate([jnp.cos(ang), -jnp.sin(ang)], axis=1)

    # Lane-dense output columns (multiple of 128); K padded up to r*hop.
    # TODO(synk): for tiny n_fft most of the 128 output lanes are zero padding;
    # packing several frames' spectra per 128-lane row would cut output HBM
    # traffic, but it is irrelevant for production n_fft >= 1024.
    Np = _round_up(2 * N, 128)
    basis = jnp.pad(basis, ((0, K_ext - n_fft), (0, Np - 2 * N)))    # (K_ext, Np)

    out = _build_stft_call(B * C, nt, tt, hop, r, K_ext, Np, total_chunks)(
        chunks, chunks, basis)                                       # (BC, Tpad, Np)

    out = out[:, :T, :2 * N].reshape(B, C, T, 2, N)
    # (B, C, T, 2, N) -> (B, N, T, 2, C), matching torch.stack over channels.
    # TODO(synk): this final permute is an extra HBM pass; drop it if downstream
    # accepts channel-major layout.
    return jnp.transpose(out, (0, 4, 2, 3, 1))


def _reference_stft(x, n_fft, hop_length):
    """Pure-JAX reference via rfft for correctness check."""
    B, L, C = x.shape
    pad = n_fft // 2
    sig = jnp.transpose(x, (0, 2, 1))
    sig = jnp.pad(sig, ((0, 0), (0, 0), (pad, pad)), mode="reflect")
    Lp = sig.shape[-1]
    T = 1 + (Lp - n_fft) // hop_length
    idx = jnp.arange(T)[:, None] * hop_length + jnp.arange(n_fft)[None, :]
    frames = sig[:, :, idx]                                  # (B, C, T, n_fft)
    k = jnp.arange(n_fft, dtype=jnp.float32)
    window = 0.5 * (1.0 - jnp.cos(2.0 * jnp.pi * k / n_fft))
    spec = jnp.fft.rfft(frames * window, axis=-1)            # (B, C, T, N)
    out = jnp.stack([spec.real, spec.imag], axis=-1)         # (B, C, T, N, 2)
    return jnp.transpose(out, (0, 3, 2, 4, 1))               # (B, N, T, 2, C)


if __name__ == "__main__":
    n_fft = 16
    hop_length = 4
    B, L, C = 2, 64, 4

    key = jax.random.PRNGKey(0)
    x = jax.random.normal(key, (B, L, C), dtype=jnp.float32)

    fn = jax.jit(functools.partial(multi_channeled_stft,
                                   n_fft=n_fft, hop_length=hop_length))
    out = fn(x)
    jax.block_until_ready(out)

    ref = _reference_stft(x, n_fft, hop_length)
    assert out.shape == (B, n_fft // 2 + 1, 1 + L // hop_length, 2, C), out.shape
    assert jnp.allclose(out, ref, atol=1e-4, rtol=1e-4), "mismatch vs rfft reference"

    print("KERNEL_OK")
</pallas_src>

<mosaic_0001>
module attributes {stable_mosaic.version = 11 : i64} {
  func.func @kernel(%arg0: i32, %arg1: i32, %arg2: memref<1x24x4xf32, #tpu.memory_space<vmem>>, %arg3: memref<1x24x4xf32, #tpu.memory_space<vmem>>, %arg4: memref<16x128xf32, #tpu.memory_space<vmem>>, %arg5: memref<1x24x128xf32, #tpu.memory_space<vmem>>) attributes {dimension_semantics = [#tpu.dimension_semantics<parallel>, #tpu.dimension_semantics<parallel>], iteration_bounds = array<i64: 8, 1>, scalar_prefetch = 0 : i64, scratch_operands = 0 : i64, tpu.core_type = #tpu.core_type<tc>, window_params = [{transform_indices = @transform_0, window_bounds = array<i64: 1, 24, 4>}, {transform_indices = @transform_1, window_bounds = array<i64: 1, 24, 4>}, {pipeline_mode = #tpu.pipeline_mode<synchronous>, transform_indices = @transform_2, window_bounds = array<i64: 16, 128>}, {transform_indices = @transform_3, window_bounds = array<i64: 1, 24, 128>}]} {
    %c0 = arith.constant 0 : index
    %c0_0 = arith.constant 0 : index
    %c0_1 = arith.constant 0 : index
    %0 = vector.load %arg2[%c0, %c0_0, %c0_1] : memref<1x24x4xf32, #tpu.memory_space<vmem>>, vector<1x24x4xf32>
    %1 = vector.shape_cast %0 : vector<1x24x4xf32> to vector<24x4xf32>
    %c0_2 = arith.constant 0 : index
    %c0_3 = arith.constant 0 : index
    %c0_4 = arith.constant 0 : index
    %2 = vector.load %arg3[%c0_2, %c0_3, %c0_4] : memref<1x24x4xf32, #tpu.memory_space<vmem>>, vector<1x3x4xf32>
    %3 = vector.shape_cast %2 : vector<1x3x4xf32> to vector<3x4xf32>
    %4 = tpu.concatenate %1, %3 in 0 : vector<24x4xf32>, vector<3x4xf32> -> vector<27x4xf32>
    %5 = vector.extract_strided_slice %4 {offsets = [0, 0], sizes = [24, 4], strides = [1, 1]} : vector<27x4xf32> to vector<24x4xf32>
    %c0_5 = arith.constant 0 : index
    %c0_6 = arith.constant 0 : index
    %6 = vector.load %arg4[%c0_5, %c0_6] : memref<16x128xf32, #tpu.memory_space<vmem>>, vector<4x128xf32>
    %cst = arith.constant dense<0.000000e+00> : vector<24x128xf32>
    %7 = tpu.matmul %5, %6, %cst {dimension_numbers = #tpu.dot_dimension_numbers<[1], [0], [0], [1], [0, 0, 1, 1], [], []>} : vector<24x4xf32>, vector<4x128xf32>, vector<24x128xf32> -> vector<24x128xf32>
    %8 = vector.extract_strided_slice %4 {offsets = [1, 0], sizes = [24, 4], strides = [1, 1]} : vector<27x4xf32> to vector<24x4xf32>
    %c4 = arith.constant 4 : index
    %c0_7 = arith.constant 0 : index
    %9 = vector.load %arg4[%c4, %c0_7] : memref<16x128xf32, #tpu.memory_space<vmem>>, vector<4x128xf32>
    %cst_8 = arith.constant dense<0.000000e+00> : vector<24x128xf32>
    %10 = tpu.matmul %8, %9, %cst_8 {dimension_numbers = #tpu.dot_dimension_numbers<[1], [0], [0], [1], [0, 0, 1, 1], [], []>} : vector<24x4xf32>, vector<4x128xf32>, vector<24x128xf32> -> vector<24x128xf32>
    %11 = arith.addf %7, %10 : vector<24x128xf32>
    %12 = vector.extract_strided_slice %4 {offsets = [2, 0], sizes = [24, 4], strides = [1, 1]} : vector<27x4xf32> to vector<24x4xf32>
    %c8 = arith.constant 8 : index
    %c0_9 = arith.constant 0 : index
    %13 = vector.load %arg4[%c8, %c0_9] : memref<16x128xf32, #tpu.memory_space<vmem>>, vector<4x128xf32>
    %cst_10 = arith.constant dense<0.000000e+00> : vector<24x128xf32>
    %14 = tpu.matmul %12, %13, %cst_10 {dimension_numbers = #tpu.dot_dimension_numbers<[1], [0], [0], [1], [0, 0, 1, 1], [], []>} : vector<24x4xf32>, vector<4x128xf32>, vector<24x128xf32> -> vector<24x128xf32>
    %15 = arith.addf %11, %14 : vector<24x128xf32>
    %16 = vector.extract_strided_slice %4 {offsets = [3, 0], sizes = [24, 4], strides = [1, 1]} : vector<27x4xf32> to vector<24x4xf32>
    %c12 = arith.constant 12 : index
    %c0_11 = arith.constant 0 : index
    %17 = vector.load %arg4[%c12, %c0_11] : memref<16x128xf32, #tpu.memory_space<vmem>>, vector<4x128xf32>
    %cst_12 = arith.constant dense<0.000000e+00> : vector<24x128xf32>
    %18 = tpu.matmul %16, %17, %cst_12 {dimension_numbers = #tpu.dot_dimension_numbers<[1], [0], [0], [1], [0, 0, 1, 1], [], []>} : vector<24x4xf32>, vector<4x128xf32>, vector<24x128xf32> -> vector<24x128xf32>
    %19 = arith.addf %15, %18 : vector<24x128xf32>
    %c0_13 = arith.constant 0 : index
    %c0_14 = arith.constant 0 : index
    %c0_15 = arith.constant 0 : index
    %20 = vector.load %arg5[%c0_13, %c0_14, %c0_15] : memref<1x24x128xf32, #tpu.memory_space<vmem>>, vector<1x24x128xf32>
    %21 = vector.shape_cast %20 : vector<1x24x128xf32> to vector<24x128xf32>
    %22 = vector.shape_cast %19 : vector<24x128xf32> to vector<1x24x128xf32>
    tpu.vector_store %arg5[%c0_13, %c0_14, %c0_15], %22 {strides = array<i32>} : memref<1x24x128xf32, #tpu.memory_space<vmem>>, vector<1x24x128xf32>,
    return
  }
  func.func @transform_0(%arg0: i32, %arg1: i32) -> (i32, i32, i32) {
    %c0_i32 = arith.constant 0 : i32
    %c0_i32_0 = arith.constant 0 : i32
    return %arg0, %arg1, %c0_i32 : i32, i32, i32
  }
  func.func @transform_1(%arg0: i32, %arg1: i32) -> (i32, i32, i32) {
    %c1_i32 = arith.constant 1 : i32
    %0 = arith.addi %arg1, %c1_i32 : i32
    %c0_i32 = arith.constant 0 : i32
    %c0_i32_0 = arith.constant 0 : i32
    return %arg0, %0, %c0_i32 : i32, i32, i32
  }
  func.func @transform_2(%arg0: i32, %arg1: i32) -> (i32, i32) {
    %c0_i32 = arith.constant 0 : i32
    %c0_i32_0 = arith.constant 0 : i32
    %c0_i32_1 = arith.constant 0 : i32
    return %c0_i32, %c0_i32_0 : i32, i32
  }
  func.func @transform_3(%arg0: i32, %arg1: i32) -> (i32, i32, i32) {
    %c0_i32 = arith.constant 0 : i32
    %c0_i32_0 = arith.constant 0 : i32
    return %arg0, %arg1, %c0_i32 : i32, i32, i32
  }
}

</mosaic_0001>

<bundles_post_ra>
// kernel: multi_channeled_stft.1
= control target key start
LH: loop header
LB: loop body
LE: loop exit
PB: predicated region body
PF: predicated region fallthrough
CT: control target
= control target key end

     0   :  { %s645_s12 = smov 0   ;;  %s647_s13 = smov 0   ;;  %s718_s0 = inlined_call_operand.vmem [shape: f32[8,48,4], index: 0, kind: input, shape index: {}, may-alias: {0,1}]   ;;  %s719_s1 = inlined_call_operand.vmem [shape: f32[8,48,4], index: 1, kind: input, shape index: {}, may-alias: {0,1}]   ;;  %s720_s2 = inlined_call_operand.vmem [shape: f32[16,128], index: 2, kind: input, shape index: {}]   ;;  %s721_s3 = inlined_call_operand.vmem [shape: f32[8,24,128], index: 3, kind: output, shape index: {}]  }
   0x1   :  { %s649_s14 = smov 0  }
   0x2 LB: > { %s25_s15 = sadd.s32 1, %s619_s13  ;;  %p549_p0 = scmp.ge.s32.totalorder %s623_s14, 1  ;;  %s623_s14 = sphi %s649_s14, %s13_s14   ;;  %s619_s13 = sphi %s647_s13, %s723_s13   ;;  %s615_s12 = sphi %s645_s12, %s722_s12  }
   0x3   : > { %p27_p1 = scmp.ge.s32.totalorder %s25_s15, 8  ;;  %p179_p2 = scmp.lt.s32.totalorder %s623_s14, 9 }
   0x5   : > { %s725_s15 = smov (%p27_p1, %s25_s15), 0  ;;  %p180_p3 = pnand %p549_p0, %p179_p2 }
   0x6   : > { %p222_p4 = scmp.lt.s32.totalorder (!%p180_p3), %s615_s12, 7 }
   0x7   : > { %183 = sbr.rel (%p180_p3) target bundleno = 173 (0xad), region = 32 }
   0xc   : > { %vm278_vm0 = vcmask 1043456   ;;  %v343_v0 = vld [vmem:[%s720_s2 + $0x8] sm:$0xf]  ;;  %v390_v1 = vld [vmem:[%s720_s2 + $0xc] sm:$0xf]  ;;  %s727_s12 = smov (!%p222_p4, %s615_s12), 7 }
   0xd   : > { %561 = vmatpush.msk.msra.mxu2 %vm278_vm0, %v343_v0  ;;  %v258_v2 = vld [vmem:[%s720_s2 + $0x4] sm:$0xf]  ;;  %565 = vmatpush.msk.msra.mxu3 %vm278_vm0, %v390_v1  ;;  %v257_v3 = vld [vmem:[%s720_s2] sm:$0xf]  ;;  %s573_s24 = smul.u32 48, %s727_s12  ;;  %vm271_vm1 = vcmask 31744  }
   0xe   : > { %553 = vmatpush.msk.msra.mxu0 %vm278_vm0, %v258_v2  ;;  %557 = vmatpush.msk.msra.mxu1 %vm278_vm0, %v257_v3  ;;  %vm344_vm2 = vcmask 1045504   ;;  %vm391_vm3 = vcmask 1044480   ;;  %vm263_vm4 = vcmask 1046528   ;;  %s575_s5 = smul.u32 24, %s727_s12 }
   0xf   : > { %s229_s27 = scalar_lea.vmem %s718_s0, %s573_s24  ;;  %s572_s28 = sadd.s32 24, %s573_s24 }
  0x10   : > { %v253_v4 = vld [vmem:[%s229_s27] sm:$0xff]  ;;  %v254_v5 = vld [vmem:[%s229_s27 + $0x8] sm:$0xff]  ;;  %v255_v12 = vld [vmem:[%s229_s27 + $0x10] sm:$0xff]  ;;  %s240_s4 = scalar_lea.vmem %s719_s1, %s572_s28  ;;  %s251_s8 = scalar_lea.vmem %s721_s3, %s575_s5 }
  0x11   : > { %v345_v6 = vrot.slane %v253_v4, 2  ;;  %v346_v7 = vrot.slane %v254_v5, 2  ;;  %v392_v8 = vrot.slane %v253_v4, 3  ;;  %v393_v9 = vrot.slane %v254_v5, 3  ;;  %558 = vmatmul.msk.f32.vlgmr.msra.gmra.mxu1 %vm271_vm1, %v253_v4  ;;  %v256_v22 = vld [vmem:[%s240_s4] sm:$0x7] }
  0x12   : > { %v264_v10 = vrot.slane %v253_v4, 1  ;;  %v265_v11 = vrot.slane %v254_v5, 1  ;;  %v348_v16 = vrot.slane %v255_v12, 2  ;;  %v395_v17 = vrot.slane %v255_v12, 3 }
  0x13   : > { %v347_v13 = vsel %vm344_vm2, %v345_v6, %v346_v7  ;;  %v394_v14 = vsel %vm391_vm3, %v392_v8, %v393_v9  ;;  %v267_v18 = vrot.slane %v255_v12, 1  ;;  %v350_v23 = vrot.slane %v256_v22, 2 }
  0x14   : > { %562 = vmatmul.msk.f32.vlgmr.msra.gmra.mxu2 %vm271_vm1, %v347_v13  ;;  %566 = vmatmul.msk.f32.vlgmr.msra.gmra.mxu3 %vm271_vm1, %v394_v14  ;;  %v266_v15 = vsel %vm263_vm4, %v264_v10, %v265_v11  ;;  %v349_v19 = vsel %vm344_vm2, %v346_v7, %v348_v16  ;;  %v396_v20 = vsel %vm391_vm3, %v393_v9, %v395_v17  ;;  %v397_v24 = vrot.slane %v256_v22, 3 }
  0x15   : > { %554 = vmatmul.msk.f32.vlgmr.msra.gmra.mxu0 %vm271_vm1, %v266_v15  ;;  %v268_v21 = vsel %vm263_vm4, %v265_v11, %v267_v18  ;;  %v269_v25 = vrot.slane %v256_v22, 1  ;;  %v351_v26 = vsel %vm344_vm2, %v348_v16, %v350_v23 }
  0x16   : > { %v398_v27 = vsel %vm391_vm3, %v395_v17, %v397_v24 }
  0x17   : > { %v270_v28 = vsel %vm263_vm4, %v267_v18, %v269_v25 }
  0x19   : > { %559 = vmatmul.msk.f32.gmra.mxu1 %vm271_vm1, %v254_v5 }
  0x1c   : > { %563 = vmatmul.msk.f32.gmra.mxu2 %vm271_vm1, %v349_v19  ;;  %567 = vmatmul.msk.f32.gmra.mxu3 %vm271_vm1, %v396_v20 }
  0x1d   : > { %555 = vmatmul.msk.f32.gmra.mxu0 %vm271_vm1, %v268_v21 }
  0x21   : > { %560 = vmatmul.msk.f32.gmra.mxu1 %vm271_vm1, %v255_v12 }
  0x24   : > { %564 = vmatmul.msk.f32.gmra.mxu2 %vm271_vm1, %v351_v26  ;;  %568 = vmatmul.msk.f32.gmra.mxu3 %vm271_vm1, %v398_v27 }
  0x25   : > { %556 = vmatmul.msk.f32.gmra.mxu0 %vm271_vm1, %v270_v28 }
  0x8e   : > { %v334_v29 = vpop.f32.mrf.mxu1 }
  0x92   : > { %v299_v30 = vpop.f32.mrf.mxu0 }
  0x93   : > { %v335_v31 = vadd.f32 %v334_v29, %v299_v30 }
  0x96   : > { %v337_v32 = vpop.f32.mrf.mxu1 }
  0x97   : > { %v378_v33 = vpop.f32.mrf.mxu2  ;;  %v425_v34 = vpop.f32.mrf.mxu3 }
  0x98   : > { %v387_v35 = vadd.f32 %v378_v33, %v335_v31 }
  0x9a   : > { %v434_v36 = vadd.f32 %v425_v34, %v387_v35  ;;  %v302_v37 = vpop.f32.mrf.mxu0 }
  0x9b   : > { %v338_v38 = vadd.f32 %v337_v32, %v302_v37 }
  0x9c   : > { %437 = vst [vmem:[%s251_s8] sm:$0xff] %v434_v36 }
  0x9e   : > { %v340_v42 = vpop.f32.mrf.mxu1 }
  0x9f   : > { %v381_v39 = vpop.f32.mrf.mxu2  ;;  %v428_v40 = vpop.f32.mrf.mxu3 }
  0xa0   : > { %v388_v41 = vadd.f32 %v381_v39, %v338_v38 }
  0xa2   : > { %v435_v43 = vadd.f32 %v428_v40, %v388_v41  ;;  %v305_v44 = vpop.f32.mrf.mxu0 }
  0xa3   : > { %v341_v45 = vadd.f32 %v340_v42, %v305_v44 }
  0xa4   : > { %438 = vst [vmem:[%s251_s8 + $0x8] sm:$0xff] %v435_v43 }
  0xa7   : > { %v384_v46 = vpop.f32.mrf.mxu2  ;;  %v431_v47 = vpop.f32.mrf.mxu3 }
  0xa8   : > { %v389_v48 = vadd.f32 %v384_v46, %v341_v45 }
  0xaa   : > { %v436_v49 = vadd.f32 %v431_v47, %v389_v48 }
  0xac   : > { %439 = vst [vmem:[%s251_s8 + $0x10] sm:$0xff] %v436_v49 }
  0xad PF: > { %s13_s14 = sadd.s32 1, %s623_s14   ;;  %s722_s12 = smov %s619_s13 }
  0xae   : > { %p10_p5 = scmp.ge.s32.totalorder %s13_s14, 10   ;;  %s723_s13 = smov %s725_s15 }
  0xb0   :  { %12 = sbr.rel (!%p10_p5) target bundleno = 2 (0x2), region = 65 }

</bundles_post_ra>
